<compile_context>
chip_gen: v7x
topology: tpu7x:2x2x1
jax: 0.10.0
libtpu: 0.0.40
codegen_flags: <defaults>
</compile_context>

<pallas_src>
import functools

import jax
import jax.numpy as jnp
from jax.experimental import pallas as pl
from jax.experimental.pallas import tpu as pltpu


# --------------------------------------------------------------------------
# helpers (glue)
# --------------------------------------------------------------------------
def adopt_weight(weight, global_step, threshold=0, value=0.0):
    # NOTE: global_step must be a static Python int (matches PyTorch usage).
    if global_step < threshold:
        weight = value
    return weight


def avg_pool2_cm(x):
    """(B, C, H, W) -> (B, C, H/2, W/2) 2x2 average pool (XLA glue)."""
    B, C, H, W = x.shape
    y = x.reshape(B, C, H // 2, 2, W // 2, 2).astype(jnp.float32).mean(axis=(3, 5))
    return y.astype(x.dtype)


def _pick_row_chunk(Ho, Wp, cap=64):
    """Largest row chunk <= cap that divides Ho and keeps the lane tile a
    multiple of 128 (or fall back to a single full-extent block)."""
    if Ho <= cap:
        return Ho
    for d in range(cap, 0, -1):
        if Ho % d == 0 and (d * Wp) % 128 == 0:
            return d
    return Ho


# --------------------------------------------------------------------------
# Pallas kernel: fused channel-major conv (in-VMEM patch gather) + bias + act
# --------------------------------------------------------------------------
def _conv_cm_kernel(x_ref, w_ref, b_ref, o_ref, *, k, Wp, Lw, act, slope):
    # x_ref block: (1, Cin, Ls)  flattened padded image (spatial on lanes)
    # w_ref block: (k*k, Cout, Cin), b_ref: (Cout, 1)
    # o_ref block: (1, Cout, Lw)  "wide" output, lane-dense stores
    acc = None
    for di in range(k):
        for dj in range(k):
            off = di * Wp + dj                       # static lane offset
            xs = x_ref[0, :, off:off + Lw]           # (Cin, Lw) bf16, VMEM gather
            wk = w_ref[di * k + dj]                  # (Cout, Cin) bf16
            d = jnp.dot(wk, xs, preferred_element_type=jnp.float32)
            acc = d if acc is None else acc + d
    acc = acc + b_ref[...]                           # (Cout, 1) broadcast
    if act == "relu":
        acc = jnp.maximum(acc, 0.0)
    elif act == "lrelu":
        acc = jnp.where(acc > 0.0, acc, slope * acc)
    o_ref[0] = acc.astype(o_ref.dtype)


def conv2d_cm(x, w, b, act="none", pad=0, slope=0.2):
    """Channel-major conv.  x: (B, Cin, H, W), w: (k, k, Cin, Cout), b: (Cout,).

    Returns (wide_output, Wo) where wide_output is (B, Cout, Ho, Wp) bf16 and
    only columns [0, Wo) are valid (the wide trick keeps every tap a single
    contiguous lane slice of the flattened input)."""
    k = w.shape[0]
    Cout = w.shape[3]
    B, Cin, H, W = x.shape
    Hp, Wp = H + 2 * pad, W + 2 * pad
    Ho, Wo = Hp - k + 1, Wp - k + 1
    Lw = Ho * Wp
    extra_rows = 1 if k > 1 else 0                   # room for the last tap's slice
    if pad or extra_rows:
        x = jnp.pad(x, ((0, 0), (0, 0), (pad, pad + extra_rows), (pad, pad)))
    Ls = (Hp + extra_rows) * Wp
    xf = x.reshape(B, Cin, Ls).astype(jnp.bfloat16)
    wt = jnp.transpose(w, (0, 1, 3, 2)).reshape(k * k, Cout, Cin).astype(jnp.bfloat16)
    b2 = b.reshape(Cout, 1).astype(jnp.float32)

    out = pl.pallas_call(
        functools.partial(_conv_cm_kernel, k=k, Wp=Wp, Lw=Lw, act=act, slope=slope),
        out_shape=jax.ShapeDtypeStruct((B, Cout, Lw), jnp.bfloat16),
        grid=(B,),
        in_specs=[
            pl.BlockSpec((1, Cin, Ls), lambda i: (i, 0, 0)),
            pl.BlockSpec((k * k, Cout, Cin), lambda i: (0, 0, 0)),
            pl.BlockSpec((Cout, 1), lambda i: (0, 0)),
        ],
        out_specs=pl.BlockSpec((1, Cout, Lw), lambda i: (i, 0, 0)),
        compiler_params=pltpu.CompilerParams(
            dimension_semantics=("parallel",),
            vmem_limit_bytes=32 * 1024 * 1024),
    )(xf, wt, b2)
    return out.reshape(B, Cout, Ho, Wp), Wo


# --------------------------------------------------------------------------
# Pallas kernel: LPIPS per-layer distance, HW-tiled with vector accumulator
# --------------------------------------------------------------------------
def _lpips_kernel(f_ref, w_ref, m_ref, o_ref, acc_ref, *, n, inv_count):
    r = pl.program_id(0)

    @pl.when(r == 0)
    def _():
        acc_ref[...] = jnp.zeros_like(acc_ref)

    eps = 1e-10
    f = f_ref[...].astype(jnp.float32)               # (2n, C, tl)
    fx, fy = f[:n], f[n:]
    # reference LPIPS normalize_tensor: x / (sqrt(sum_c x^2) + eps)
    rx = pl.reciprocal(jnp.sqrt(jnp.sum(fx * fx, axis=1, keepdims=True)) + eps,
                       approx=True)
    ry = pl.reciprocal(jnp.sqrt(jnp.sum(fy * fy, axis=1, keepdims=True)) + eps,
                       approx=True)
    d = (fx * rx - fy * ry) ** 2                     # (n, C, tl)
    wd = d * w_ref[...]                              # (1, C, 1) broadcast
    # channel-sum per step (needed anyway); garbage/pad lanes masked to 0.
    acc_ref[...] += jnp.sum(wd, axis=1) * m_ref[0]   # (n, tl) VPU accumulate

    @pl.when(r == pl.num_programs(0) - 1)
    def _():
        o_ref[...] = jnp.sum(acc_ref[...], axis=1, keepdims=True) * inv_count


def lpips_layer(feat_wide, lin_w, n, Wo):
    """feat_wide: (2n, C, Ho, Wp) bf16 (x stacked over y), valid cols [0, Wo).
    Returns per-sample (n, 1) weighted, spatially averaged distance."""
    B2, C, Ho, Wp = feat_wide.shape
    assert B2 == 2 * n
    rh = _pick_row_chunk(Ho, Wp)
    tl = rh * Wp
    f3 = feat_wide.reshape(B2, C, Ho * Wp)
    w3 = lin_w.reshape(1, C, 1).astype(jnp.float32)
    # periodic valid-column mask (same block every grid step, stays in VMEM)
    lane = jnp.arange(tl, dtype=jnp.int32) % Wp
    mask = (lane < Wo).astype(jnp.float32).reshape(1, 1, tl)

    out = pl.pallas_call(
        functools.partial(_lpips_kernel, n=n, inv_count=1.0 / (Ho * Wo)),
        out_shape=jax.ShapeDtypeStruct((n, 1), jnp.float32),
        grid=(Ho // rh,),
        in_specs=[
            pl.BlockSpec((B2, C, tl), lambda r: (0, 0, r)),
            pl.BlockSpec((1, C, 1), lambda r: (0, 0, 0)),
            pl.BlockSpec((1, 1, tl), lambda r: (0, 0, 0)),
        ],
        out_specs=pl.BlockSpec((n, 1), lambda r: (0, 0)),
        scratch_shapes=[pltpu.VMEM((n, tl), jnp.float32)],
        compiler_params=pltpu.CompilerParams(
            dimension_semantics=("arbitrary",),
            vmem_limit_bytes=32 * 1024 * 1024),
    )(f3, w3, mask)
    return out


# --------------------------------------------------------------------------
# Pallas kernel: streaming reconstruction-loss mean (vector accumulator)
# --------------------------------------------------------------------------
def _recon_kernel(x_ref, y_ref, o_ref, acc_ref, *, loss_type, rows_valid, tr,
                  inv_count, masked):
    i = pl.program_id(0)

    @pl.when(i == 0)
    def _():
        acc_ref[...] = jnp.zeros_like(acc_ref)

    d = x_ref[...] - y_ref[...]
    r = jnp.abs(d) if loss_type == "L1" else d * d
    if masked:
        # ragged tail rows of the last block (no jnp.pad copy in the wrapper)
        row_ids = i * tr + jax.lax.broadcasted_iota(jnp.int32, r.shape, 0)
        r = jnp.where(row_ids < rows_valid, r, 0.0)
    acc_ref[...] += r                                # pure-VPU hot loop

    @pl.when(i == pl.num_programs(0) - 1)
    def _():
        o_ref[...] = jnp.sum(acc_ref[...], keepdims=True) * inv_count


def recon_loss_mean(x, y, loss_type):
    HW = x.shape[-2] * x.shape[-1]
    x2 = x.reshape(-1, HW).astype(jnp.float32)       # free reshape, no pad
    y2 = y.reshape(-1, HW).astype(jnp.float32)
    R = x2.shape[0]
    # ~2 MiB row tiles (amortizes per-grid-step overhead on v7x as well)
    target = max(8, (2 * 1024 * 1024 // max(HW * 4, 1)) // 8 * 8)
    tr = R if target >= R else target
    grid_r = pl.cdiv(R, tr)
    masked = (grid_r * tr != R)

    out = pl.pallas_call(
        functools.partial(_recon_kernel, loss_type=loss_type, rows_valid=R,
                          tr=tr, inv_count=1.0 / x.size, masked=masked),
        out_shape=jax.ShapeDtypeStruct((1, 1), jnp.float32),
        grid=(grid_r,),
        in_specs=[pl.BlockSpec((tr, HW), lambda i: (i, 0)),
                  pl.BlockSpec((tr, HW), lambda i: (i, 0))],
        out_specs=pl.BlockSpec((1, 1), lambda i: (0, 0)),
        scratch_shapes=[pltpu.VMEM((tr, HW), jnp.float32)],
        compiler_params=pltpu.CompilerParams(
            dimension_semantics=("arbitrary",),
            vmem_limit_bytes=32 * 1024 * 1024),
    )(x2, y2)
    return out[0, 0]


# --------------------------------------------------------------------------
# Pallas kernel: softplus mean of a small logit vector (single block)
# --------------------------------------------------------------------------
def _softplus_mean_kernel(x_ref, o_ref, *, sign, inv_count):
    z = sign * x_ref[...].astype(jnp.float32)
    o_ref[...] = jnp.sum(jnp.logaddexp(z, 0.0), keepdims=True) * inv_count


def softplus_mean(logits, sign):
    B, C = logits.shape
    out = pl.pallas_call(
        functools.partial(_softplus_mean_kernel, sign=sign,
                          inv_count=1.0 / logits.size),
        out_shape=jax.ShapeDtypeStruct((1, 1), jnp.float32),
        grid=(1,),
        in_specs=[pl.BlockSpec((B, C), lambda i: (0, 0))],
        out_specs=pl.BlockSpec((1, 1), lambda i: (0, 0)),
    )(logits.astype(jnp.float32))
    return out[0, 0]


# --------------------------------------------------------------------------
# Pallas kernel: discriminator head as VPU multiply+reduce (N output = 1)
# --------------------------------------------------------------------------
def _head_kernel(h_ref, w_ref, b_ref, o_ref):
    h = h_ref[...].astype(jnp.float32)               # (B, D)
    w = w_ref[...].astype(jnp.float32)               # (1, D)
    o_ref[...] = jnp.sum(h * w, axis=-1, keepdims=True) + b_ref[0, 0]


def head_dot_bias(h, w, b):
    B, D = h.shape
    w2 = w.reshape(1, D).astype(jnp.float32)
    b2 = jnp.asarray(b, jnp.float32).reshape(1, 1)
    out = pl.pallas_call(
        _head_kernel,
        out_shape=jax.ShapeDtypeStruct((B, 1), jnp.float32),
        grid=(1,),
        in_specs=[pl.BlockSpec((B, D), lambda i: (0, 0)),
                  pl.BlockSpec((1, D), lambda i: (0, 0)),
                  pl.BlockSpec((1, 1), lambda i: (0, 0))],
        out_specs=pl.BlockSpec((B, 1), lambda i: (0, 0)),
    )(h.astype(jnp.float32), w2, b2)
    return out


# --------------------------------------------------------------------------
# deterministic synthetic parameters
# --------------------------------------------------------------------------
def _init_params(key, in_channels):
    ks = jax.random.split(key, 10)
    p = {}
    # synthetic LPIPS feature net (VGG stand-in): 3 scales
    f1, f2, f3 = 8, 16, 32
    p["lp_w1"] = 0.1 * jax.random.normal(ks[0], (3, 3, in_channels, f1), jnp.float32)
    p["lp_b1"] = jnp.zeros((f1,), jnp.float32)
    p["lp_w2"] = 0.1 * jax.random.normal(ks[1], (3, 3, f1, f2), jnp.float32)
    p["lp_b2"] = jnp.zeros((f2,), jnp.float32)
    p["lp_w3"] = 0.1 * jax.random.normal(ks[2], (3, 3, f2, f3), jnp.float32)
    p["lp_b3"] = jnp.zeros((f3,), jnp.float32)
    # LPIPS linear (1x1 conv) layer weights, non-negative as in LPIPS
    p["lp_lin1"] = jnp.abs(jax.random.normal(ks[3], (f1,), jnp.float32))
    p["lp_lin2"] = jnp.abs(jax.random.normal(ks[4], (f2,), jnp.float32))
    p["lp_lin3"] = jnp.abs(jax.random.normal(ks[5], (f3,), jnp.float32))
    # synthetic ProgressiveDiscriminator (alpha fade-in between two fromRGBs)
    F = 16
    p["d_from_hi_w"] = 0.1 * jax.random.normal(ks[6], (3, 3, in_channels, F), jnp.float32)
    p["d_from_hi_b"] = jnp.zeros((F,), jnp.float32)
    p["d_from_lo_w"] = 0.1 * jax.random.normal(ks[7], (1, 1, in_channels, F), jnp.float32)
    p["d_from_lo_b"] = jnp.zeros((F,), jnp.float32)
    p["d_conv1_w"] = 0.1 * jax.random.normal(ks[8], (3, 3, F, 2 * F), jnp.float32)
    p["d_conv1_b"] = jnp.zeros((2 * F,), jnp.float32)
    p["d_head_w"] = 0.1 * jax.random.normal(ks[9], (4 * 4 * 2 * F, 1), jnp.float32)
    p["d_head_b"] = jnp.zeros((1,), jnp.float32)
    return p


# --------------------------------------------------------------------------
# module
# --------------------------------------------------------------------------
class LPIPSWithDiscriminatorPallas:
    def __init__(self, disc_start, fade_steps=10000, disc_factor=1.0,
                 nll_factor=1.0, perceptual_weight=1.0, lambda_d_r1=10,
                 disc_loss="softplus", recon_loss="L1", in_channels=3, seed=0):
        assert disc_loss in ["hinge", "vanilla", "softplus"]
        assert recon_loss in ["L1", "L2"]
        # The reference forward only exercises the 'softplus' signature.
        assert disc_loss == "softplus", "only softplus path is exercised by forward()"
        self.perceptual_weight = perceptual_weight
        self.fade_steps = fade_steps
        self.lambda_d_r1 = lambda_d_r1
        self.nll_factor = nll_factor
        self.discriminator_iter_start = disc_start
        self.disc_factor = disc_factor
        self.recon_loss_type = recon_loss
        # Synthetic discriminator uses the common ProgressiveDiscriminator
        # slope of 0.2.  TODO(synk): verify against the real checkpoint
        # (PyTorch nn.LeakyReLU default would be 0.01).
        self.lrelu_slope = 0.2
        self.params = _init_params(jax.random.PRNGKey(seed + 1234), in_channels)

    # synthetic LPIPS: x and y share one batched pass through the conv stack
    def _lpips(self, x, y):
        p = self.params
        n = x.shape[0]
        xy = jnp.concatenate([x, y], axis=0)                     # (2n, C, H, W)
        f1w, wo1 = conv2d_cm(xy, p["lp_w1"], p["lp_b1"], act="relu", pad=1)
        d = lpips_layer(f1w, p["lp_lin1"], n, wo1)
        f1 = avg_pool2_cm(f1w[:, :, :, :wo1])
        f2w, wo2 = conv2d_cm(f1, p["lp_w2"], p["lp_b2"], act="relu", pad=1)
        d = d + lpips_layer(f2w, p["lp_lin2"], n, wo2)
        f2 = avg_pool2_cm(f2w[:, :, :, :wo2])
        f3w, wo3 = conv2d_cm(f2, p["lp_w3"], p["lp_b3"], act="relu", pad=1)
        d = d + lpips_layer(f3w, p["lp_lin3"], n, wo3)
        return d                                                 # (n, 1) per-sample

    # synthetic ProgressiveDiscriminator with alpha fade-in blend
    def _discriminator(self, x, alpha):
        p = self.params
        s = self.lrelu_slope
        hiw, wo_hi = conv2d_cm(x, p["d_from_hi_w"], p["d_from_hi_b"],
                               act="lrelu", pad=1, slope=s)
        hi = avg_pool2_cm(hiw[:, :, :, :wo_hi])                  # (B, F, H/2, W/2)
        low, wo_lo = conv2d_cm(avg_pool2_cm(x), p["d_from_lo_w"],
                               p["d_from_lo_b"], act="lrelu", pad=0, slope=s)
        lo = low[:, :, :, :wo_lo]                                # (B, F, H/2, W/2)
        h = alpha * hi.astype(jnp.float32) + (1.0 - alpha) * lo.astype(jnp.float32)
        h1w, wo1 = conv2d_cm(h, p["d_conv1_w"], p["d_conv1_b"],
                             act="lrelu", pad=1, slope=s)
        h1 = avg_pool2_cm(h1w[:, :, :, :wo1])                    # (B, 2F, H/4, W/4)
        hf = h1.reshape(h1.shape[0], -1).astype(jnp.float32)
        assert hf.shape[1] == p["d_head_w"].shape[0], \
            "synthetic discriminator head expects 16x16 spatial inputs"
        return head_dot_bias(hf, p["d_head_w"][:, 0], p["d_head_b"][0])  # (B,1)

    def __call__(self, inputs, reconstructions, optimizer_idx, global_step,
                 split="train"):
        # inputs / reconstructions: NCHW (PyTorch convention) = channel-major
        x = inputs.astype(jnp.float32)
        y = reconstructions.astype(jnp.float32)
        n = x.shape[0]

        rec_mean = recon_loss_mean(x, y, self.recon_loss_type)

        if self.perceptual_weight > 0 or split != "train":
            p_loss = self._lpips(x, y)                           # (n, 1)
        else:
            p_loss = jnp.zeros((n, 1), jnp.float32)
        p_mean = jnp.mean(p_loss)

        # mean(rec_loss + w * broadcast(p_loss)) == mean(rec) + w * mean(p)
        nll_loss = rec_mean + self.perceptual_weight * p_mean

        # NOTE: global_step is a static Python int (same as PyTorch reference).
        alpha = min(1.0, global_step / self.fade_steps)
        disc_factor = adopt_weight(self.disc_factor, global_step,
                                   threshold=self.discriminator_iter_start)

        if optimizer_idx == 0:
            logits_fake = self._discriminator(y, alpha)
            g_loss = softplus_mean(logits_fake, sign=-1.0)       # softplus(-fake).mean()
            loss = self.nll_factor * nll_loss + disc_factor * g_loss
            log = {
                f"{split}/total_loss": loss,
                f"{split}/nll_loss": nll_loss,
                f"{split}/rec_loss": rec_mean,
                f"{split}/p_loss": p_mean,
                f"{split}/disc_factor": jnp.asarray(disc_factor, jnp.float32),
                f"{split}/g_loss": g_loss,
            }
            return loss, log

        if optimizer_idx == 1:
            # real and fake share one batched discriminator pass.
            logits = self._discriminator(jnp.concatenate([x, y], axis=0), alpha)
            logits_real, logits_fake = logits[:n], logits[n:]
            d_loss = disc_factor * (softplus_mean(logits_fake, sign=1.0)
                                    + softplus_mean(logits_real, sign=-1.0))
            # TODO(synk): R1 gradient penalty (autograd of logits_real.sum()
            # wrt inputs) requires differentiating through the Pallas
            # discriminator (custom_vjp); eval-mode behavior (grad_penalty=0)
            # is reproduced here.
            grad_penalty = jnp.asarray(0.0, jnp.float32)
            log = {
                f"{split}/disc_loss": d_loss,
                f"{split}/grad_penalty": grad_penalty,
                f"{split}/logits_real": jnp.mean(logits_real),
                f"{split}/logits_fake": jnp.mean(logits_fake),
            }
            return d_loss + grad_penalty, log


# --------------------------------------------------------------------------
if __name__ == "__main__":
    key = jax.random.PRNGKey(0)
    k1, k2 = jax.random.split(key)
    N, C, H, W = 2, 3, 16, 16                          # NCHW example inputs
    inputs = jax.random.normal(k1, (N, C, H, W), jnp.float32)
    recons = jax.random.normal(k2, (N, C, H, W), jnp.float32)

    mod = LPIPSWithDiscriminatorPallas(disc_start=0, in_channels=C)

    loss_g, log_g = mod(inputs, recons, optimizer_idx=0, global_step=100)
    jax.block_until_ready(loss_g)
    loss_d, log_d = mod(inputs, recons, optimizer_idx=1, global_step=100)
    jax.block_until_ready(loss_d)

    print("KERNEL_OK")
</pallas_src>

<mosaic_0001>
module attributes {stable_mosaic.version = 11 : i64} {
  func.func @_recon_kernel(%arg0: i32, %arg1: memref<6x256xf32, #tpu.memory_space<vmem>>, %arg2: memref<6x256xf32, #tpu.memory_space<vmem>>, %arg3: memref<1x1xf32, #tpu.memory_space<vmem>>, %arg4: memref<6x256xf32, #tpu.memory_space<vmem>>) attributes {dimension_semantics = [#tpu.dimension_semantics<arbitrary>], iteration_bounds = array<i64: 1>, scalar_prefetch = 0 : i64, scratch_operands = 1 : i64, tpu.core_type = #tpu.core_type<tc>, window_params = [{transform_indices = @transform_0, window_bounds = array<i64: 6, 256>}, {transform_indices = @transform_1, window_bounds = array<i64: 6, 256>}, {pipeline_mode = #tpu.pipeline_mode<synchronous>, transform_indices = @transform_2, window_bounds = array<i64: 1, 1>}]} {
    %c0_i32 = arith.constant 0 : i32
    %0 = arith.cmpi eq, %arg0, %c0_i32 : i32
    %1 = arith.extui %0 : i1 to i32
    %c0_i32_0 = arith.constant 0 : i32
    %2 = arith.cmpi ne, %1, %c0_i32_0 : i32
    scf.if %2 {
      %cst = arith.constant 0.000000e+00 : f32
      %13 = vector.broadcast %cst : f32 to vector<6x256xf32>
      %c0_10 = arith.constant 0 : index
      %c0_11 = arith.constant 0 : index
      %14 = vector.load %arg4[%c0_10, %c0_11] : memref<6x256xf32, #tpu.memory_space<vmem>>, vector<6x256xf32>
      tpu.vector_store %arg4[%c0_10, %c0_11], %13 {strides = array<i32>} : memref<6x256xf32, #tpu.memory_space<vmem>>, vector<6x256xf32>,
    } else {
    }
    %c0 = arith.constant 0 : index
    %c0_1 = arith.constant 0 : index
    %3 = vector.load %arg1[%c0, %c0_1] : memref<6x256xf32, #tpu.memory_space<vmem>>, vector<6x256xf32>
    %c0_2 = arith.constant 0 : index
    %c0_3 = arith.constant 0 : index
    %4 = vector.load %arg2[%c0_2, %c0_3] : memref<6x256xf32, #tpu.memory_space<vmem>>, vector<6x256xf32>
    %5 = arith.subf %3, %4 : vector<6x256xf32>
    %6 = math.absf %5 : vector<6x256xf32>
    %c0_4 = arith.constant 0 : index
    %c0_5 = arith.constant 0 : index
    %7 = vector.load %arg4[%c0_4, %c0_5] : memref<6x256xf32, #tpu.memory_space<vmem>>, vector<6x256xf32>
    %8 = arith.addf %7, %6 : vector<6x256xf32>
    %c0_6 = arith.constant 0 : index
    %c0_7 = arith.constant 0 : index
    %9 = vector.load %arg4[%c0_6, %c0_7] : memref<6x256xf32, #tpu.memory_space<vmem>>, vector<6x256xf32>
    tpu.vector_store %arg4[%c0_6, %c0_7], %8 {strides = array<i32>} : memref<6x256xf32, #tpu.memory_space<vmem>>, vector<6x256xf32>,
    %c0_i32_8 = arith.constant 0 : i32
    %10 = arith.cmpi eq, %arg0, %c0_i32_8 : i32
    %11 = arith.extui %10 : i1 to i32
    %c0_i32_9 = arith.constant 0 : i32
    %12 = arith.cmpi ne, %11, %c0_i32_9 : i32
    scf.if %12 {
      %c0_10 = arith.constant 0 : index
      %c0_11 = arith.constant 0 : index
      %13 = vector.load %arg4[%c0_10, %c0_11] : memref<6x256xf32, #tpu.memory_space<vmem>>, vector<6x256xf32>
      %14 = vector.shape_cast %13 : vector<6x256xf32> to vector<1x6x256xf32>
      %cst = arith.constant dense<0.000000e+00> : vector<1xf32>
      %15 = vector.multi_reduction <add>, %14, %cst [1, 2] : vector<1x6x256xf32> to vector<1xf32>
      %16 = vector.shape_cast %15 : vector<1xf32> to vector<1x1x1xf32>
      %17 = vector.extract %16[0, 0, 0] : f32 from vector<1x1x1xf32>
      %18 = vector.broadcast %17 : f32 to vector<1x1xf32>
      %cst_12 = arith.constant 6.51041686E-4 : f32
      %19 = vector.broadcast %cst_12 : f32 to vector<1x1xf32>
      %20 = arith.mulf %18, %19 : vector<1x1xf32>
      %c0_13 = arith.constant 0 : index
      %c0_14 = arith.constant 0 : index
      %21 = vector.load %arg3[%c0_13, %c0_14] : memref<1x1xf32, #tpu.memory_space<vmem>>, vector<1x1xf32>
      tpu.vector_store %arg3[%c0_13, %c0_14], %20 {strides = array<i32>} : memref<1x1xf32, #tpu.memory_space<vmem>>, vector<1x1xf32>,
    } else {
    }
    return
  }
  func.func @transform_0(%arg0: i32) -> (i32, i32) {
    %c0_i32 = arith.constant 0 : i32
    %c0_i32_0 = arith.constant 0 : i32
    return %arg0, %c0_i32 : i32, i32
  }
  func.func @transform_1(%arg0: i32) -> (i32, i32) {
    %c0_i32 = arith.constant 0 : i32
    %c0_i32_0 = arith.constant 0 : i32
    return %arg0, %c0_i32 : i32, i32
  }
  func.func @transform_2(%arg0: i32) -> (i32, i32) {
    %c0_i32 = arith.constant 0 : i32
    %c0_i32_0 = arith.constant 0 : i32
    %c0_i32_1 = arith.constant 0 : i32
    return %c0_i32, %c0_i32_0 : i32, i32
  }
}

</mosaic_0001>

<bundles_post_ra>
// kernel: tpu_custom_call.1
= control target key start
LH: loop header
LB: loop body
LE: loop exit
PB: predicated region body
PF: predicated region fallthrough
CT: control target
= control target key end

     0   :  { %7 = vsyncpa [#allocation4], 0  ;;  %s227_s0 = inlined_call_operand.hbm [shape: f32[6,256], index: 0, kind: input, shape index: {}]   ;;  %s228_s1 = inlined_call_operand.hbm [shape: f32[6,256], index: 1, kind: input, shape index: {}]   ;;  %s229_s2 = inlined_call_operand.hbm [shape: f32[1,1], index: 2, kind: output, shape index: {}]  }
   0x1   :  { %8 = vsyncpa [#allocation7], 0 }
   0x2   :  { %9 = vsyncpa [#allocation5], 0  ;;  %s172_s9 = smov [#allocation3]   ;;  %s173_s11 = smov [#allocation6]  }
   0x3   :  { %s16_s10 = sshll.u32 %s172_s9, 4  ;;  %s26_s12 = sshll.u32 %s173_s11, 4  ;;  %s17_s10 = int_to_ptr.vmem [resolvable:$true] %s16_s10  ;;  %s27_s12 = int_to_ptr.vmem [resolvable:$true] %s26_s12 }
   0x4   :  { %s100_s15 = scalar_lea.hbm %s227_s0, 256 }
   0x5   :  { %p101_p0 = scmp.ne.s32.totalorder %s227_s0, %s100_s15  ;;  %p104_p1 = scmp.lt.u32.totalorder %s100_s15, %s227_s0 }
   0x7   :  { %p106_p2 = pnand %p104_p1, %p101_p0 }
   0x9   :  { %109 = shalt.err (!%p106_p2)
}
   0xa   :  { %s110_s20 = scalar_lea.vmem %s17_s10, 256  ;;  %p115_p4 = scmp.lt.s32.totalorder %s17_s10, %s17_s10 }
   0xb   :  { %p111_p3 = scmp.ne.s32.totalorder %s17_s10, %s110_s20  ;;  %p116_p5 = scmp.lt.s32.totalorder %s110_s20, %s110_s20 }
   0xd   :  { %p117_p6 = por %p116_p5, %p115_p4 }
   0xf   :  { %p118_p7 = pnand %p117_p6, %p111_p3 }
  0x11   :  { %121 = shalt.err (!%p118_p7)
}
  0x12   :  { %19 = dma.hbm_to_vmem [thread:$0]  %s227_s0, 256, %s17_s10, [#allocation4]  }
  0x13   :  { %s122_s25 = scalar_lea.hbm %s228_s1, 256 }
  0x14   :  { %p123_p8 = scmp.ne.s32.totalorder %s228_s1, %s122_s25  ;;  %p126_p9 = scmp.lt.u32.totalorder %s122_s25, %s228_s1 }
  0x16   :  { %p128_p10 = pnand %p126_p9, %p123_p8 }
  0x18   :  { %131 = shalt.err (!%p128_p10)
}
  0x19   :  { %s132_s30 = scalar_lea.vmem %s27_s12, 256  ;;  %p137_p12 = scmp.lt.s32.totalorder %s27_s12, %s27_s12 }
  0x1a   :  { %p133_p11 = scmp.ne.s32.totalorder %s27_s12, %s132_s30  ;;  %p138_p13 = scmp.lt.s32.totalorder %s132_s30, %s132_s30 }
  0x1c   :  { %p139_p0 = por %p138_p13, %p137_p12 }
  0x1e   :  { %p140_p1 = pnand %p139_p0, %p133_p11 }
  0x20   :  { %143 = shalt.err (!%p140_p1)
}
  0x21   :  { %29 = dma.hbm_to_vmem [thread:$0]  %s228_s1, 256, %s27_s12, [#allocation7]  }
  0x22   :  { %166 = dma.done.wait [#allocation4], 256  }
  0x23   :  { %167 = vsyncadd [#allocation4], 4294967040 }
  0x24   :  { %168 = dma.done.wait [#allocation7], 256  }
  0x25   :  { %169 = vsyncadd [#allocation7], 4294967040  ;;  %v174_v0 = vmov 0.0   ;;  %v42_v1 = vld [vmem:[#allocation3] sm:$0x3f]  ;;  %vm61_vm0 = vcmask 1045504  }
  0x26   :  { %40 = vst [vmem:[#allocation2] sm:$0x3f] %v174_v0  ;;  %41 = vst [vmem:[#allocation2 + $0x8] sm:$0x3f] %v174_v0  ;;  %v43_v2 = vld [vmem:[#allocation3 + $0x8] sm:$0x3f] }
  0x27   :  { %v44_v3 = vld [vmem:[#allocation6] sm:$0x3f]  ;;  %v45_v4 = vld [vmem:[#allocation6 + $0x8] sm:$0x3f]  ;;  %s175_s1 = smov [#allocation8]   ;;  %vm76_vm1 = vcmask 0  }
  0x28   :  { %v46_v5 = vsub.f32 %v42_v1, %v44_v3  ;;  %v47_v6 = vsub.f32 %v43_v2, %v45_v4  ;;  %s84_s4 = sshll.u32 %s175_s1, 4  ;;  %s85_s4 = int_to_ptr.vmem [resolvable:$true] %s84_s4 }
  0x29   :  { %s144_s6 = scalar_lea.vmem %s85_s4, 16  ;;  %s148_s7 = scalar_lea.vmem %s85_s4, 32 }
  0x2a   :  { %v48_v8 = vand.u32 2147483647, %v46_v5  ;;  %v49_v10 = vand.u32 2147483647, %v47_v6  ;;  %p145_p2 = scmp.ne.s32.totalorder %s85_s4, %s144_s6  ;;  %p149_p3 = scmp.lt.s32.totalorder %s85_s4, %s85_s4 }
  0x2b   :  { %p150_p4 = scmp.lt.s32.totalorder %s148_s7, %s144_s6 }
  0x2d   :  { %v50_v7 = vld [vmem:[#allocation2] sm:$0x3f]  ;;  %v51_v9 = vld [vmem:[#allocation2 + $0x8] sm:$0x3f]  ;;  %p151_p5 = por %p150_p4, %p149_p3 }
  0x2e   :  { %v52_v11 = vadd.f32 %v50_v7, %v48_v8  ;;  %v53_v12 = vadd.f32 %v51_v9, %v49_v10 }
  0x2f   :  { %p152_p6 = pnand %p151_p5, %p145_p2 }
  0x30   :  { %54 = vst [vmem:[#allocation2] sm:$0x3f] %v52_v11  ;;  %55 = vst [vmem:[#allocation2 + $0x8] sm:$0x3f] %v53_v12 }
  0x37   :  { %v59_v13 = vld [vmem:[#allocation2] sm:$0x3f]  ;;  %v60_v14 = vld [vmem:[#allocation2 + $0x8] sm:$0x3f] }
  0x38   :  { %v62_v15 = vsel %vm61_vm0, %v59_v13, 0.0  ;;  %v63_v16 = vsel %vm61_vm0, %v60_v14, 0.0 }
  0x39   :  { %v64_v17 = vadd.f32 %v63_v16, %v62_v15 }
  0x3b   :  { %65 = vadd.xlane.f32.xlu0 %v64_v17 }
  0xc8   :  { %v66_v18 = vpop.xlane.xlu0 %65 }
  0xc9   :  { %v67_v19 = vrot.slane %v66_v18, 4 }
  0xcb   :  { %v68_v20 = vadd.f32 %v67_v19, %v66_v18 }
  0xcd   :  { %v69_v21 = vrot.slane %v68_v20, 2 }
  0xcf   :  { %v70_v22 = vadd.f32 %v69_v21, %v68_v20 }
  0xd1   :  { %v71_v23 = vrot.slane %v70_v22, 1 }
  0xd3   :  { %v72_v24 = vadd.f32 %v71_v23, %v70_v22 }
  0xd5   :  { %94 = vpush %v72_v24 }
 0x106   :  { %s95_s5 = spop %94 }
 0x107   :  { %v74_v25 = vstv %s95_s5 }
 0x108   :  { %v75_v26 = vmul.f32 0.0006510417, %v74_v25 }
 0x10a   :  { %77 = vst.msk [vmem:[#allocation8] sm:$0x1] %vm76_vm1, %v75_v26 }
 0x10b   :  { %155 = shalt.err (!%p152_p6)
}
 0x10c   :  { %s156_s10 = scalar_lea.hbm %s229_s2, 16 }
 0x10d   :  { %p157_p7 = scmp.ne.s32.totalorder %s229_s2, %s156_s10  ;;  %p160_p8 = scmp.lt.u32.totalorder %s156_s10, %s229_s2 }
 0x10f   :  { %p162_p9 = pnand %p160_p8, %p157_p7 }
 0x111   :  { %165 = shalt.err (!%p162_p9)
}
 0x112   :  { %87 = dma.vmem_to_hbm [thread:$0]  %s85_s4, 16, %s229_s2, [#allocation5]  }
 0x113   :  { %170 = dma.done.wait [#allocation5], 16  }
 0x114   :  { %171 = vsyncadd [#allocation5], 4294967280 }
 0x115   :  { %91 = vsyncpa [#allocation4], 1 }
 0x116   :  { %92 = vsyncpa [#allocation7], 1 }
 0x117   :  { %93 = vsyncpa [#allocation5], 1 }

</bundles_post_ra>
